<compile_context>
chip_gen: v6e
topology: v6e:2x2x1
jax: 0.10.0
libtpu: 0.0.40
codegen_flags: <defaults>
</compile_context>

<pallas_src>
import numpy as np

import jax
import jax.numpy as jnp
from jax.experimental import pallas as pl
from jax.experimental.pallas import tpu as pltpu

QUANT_MIN = 0      # default quint8 FakeQuantize range
QUANT_MAX = 255

_LANE_TILE_CAP = 2048       # lanes per grid step (multiple of 128)
_VMEM_TILE_BUDGET = 8 << 20  # conservative per-step working-set budget (bytes)
                             # so 2x double-buffering fits the default scoped
                             # VMEM limit on every chip generation.


def _make_qconcat_kernel(c_sizes, quant_min, quant_max):
    """Kernel fusing concat (along the middle axis) + per-tensor fake quant."""
    qmin = float(quant_min)
    qmax = float(quant_max)
    n_in = len(c_sizes)

    def kernel(params_ref, *refs):
        x_refs = refs[:n_in]
        out_ref = refs[n_in]

        scale = params_ref[0]       # f32 scalar from SMEM
        inv_scale = params_ref[1]   # exact host-computed 1/scale (f32)
        zp = params_ref[2]          # zero_point as f32

        # NOTE: c_i can be tiny (sublane-masked stores), but the kernel is
        # DMA-bound so the store slot never binds here.
        off = 0
        for c, x_ref in zip(c_sizes, x_refs):
            x = x_ref[...].astype(jnp.float32)
            q = jnp.clip(jnp.round(x * inv_scale + zp), qmin, qmax)
            y = (q - zp) * scale
            out_ref[:, off:off + c, :] = y.astype(out_ref.dtype)
            off += c

    return kernel


def _choose_lane_tile(post, c_total, bytes_per_elem):
    """Pick the lane-tile width for the grid over `post`."""
    if post <= _LANE_TILE_CAP:
        return post  # full lane extent (always a legal block shape)
    # Per grid step: inputs (sum c_i = c_total rows) + output (c_total rows),
    # double buffered => ~4 * c_total * TL * bytes.
    max_tl = _VMEM_TILE_BUDGET // max(1, 4 * c_total * bytes_per_elem)
    tl = (min(_LANE_TILE_CAP, max_tl) // 128) * 128
    return max(tl, 128)


def qconcat(xs, dim=0, *, scale=0.05, zero_point=128,
            quant_min=QUANT_MIN, quant_max=QUANT_MAX, lane_tile=None):
    """JAX/Pallas equivalent of QConcat.forward(X, dim) in eval mode."""
    if not isinstance(xs, (list, tuple)) or len(xs) == 0:
        raise TypeError("xs must be a non-empty list/tuple of arrays")
    xs = [jnp.asarray(x) for x in xs]

    ndim = xs[0].ndim
    if ndim == 0:
        raise ValueError("cannot concatenate 0-d arrays")
    dim = dim % ndim

    dtype = xs[0].dtype
    lead = xs[0].shape[:dim]
    trail = xs[0].shape[dim + 1:]
    for x in xs:
        if x.dtype != dtype or x.shape[:dim] != lead or x.shape[dim + 1:] != trail:
            raise ValueError("all inputs must share dtype and non-concat dims")

    pre = int(np.prod(lead)) if lead else 1
    post = int(np.prod(trail)) if trail else 1
    c_sizes = tuple(int(x.shape[dim]) for x in xs)
    c_total = sum(c_sizes)

    # Pure reshapes (no transpose): (pre, c_i, post).
    xs3 = [x.reshape(pre, c, post) for x, c in zip(xs, c_sizes)]

    bytes_per = max(jnp.dtype(dtype).itemsize, 4)  # f32 upcast in vregs
    if lane_tile is None:
        tl = _choose_lane_tile(post, c_total, bytes_per)
    else:
        tl = min(int(lane_tile), post)
        if tl < post and tl % 128 != 0:
            raise ValueError("lane_tile must be a multiple of 128 when < post")
    n_lane = pl.cdiv(post, tl)

    # Exact (non-approximate) reciprocal, matching torch's inv_scale path.
    inv_scale = float(np.float32(1.0) / np.float32(scale))
    params = jnp.asarray([float(scale), inv_scale, float(zero_point)],
                         dtype=jnp.float32)

    kernel = _make_qconcat_kernel(c_sizes, quant_min, quant_max)

    out3 = pl.pallas_call(
        kernel,
        out_shape=jax.ShapeDtypeStruct((pre, c_total, post), dtype),
        grid=(pre, n_lane),
        in_specs=(
            [pl.BlockSpec(memory_space=pltpu.MemorySpace.SMEM)]   # qparams
            + [pl.BlockSpec((1, c, tl), lambda p, j: (p, 0, j))
               for c in c_sizes]
        ),
        out_specs=pl.BlockSpec((1, c_total, tl), lambda p, j: (p, 0, j)),
        compiler_params=pltpu.CompilerParams(
            dimension_semantics=("parallel", "parallel")),
    )(params, *xs3)

    return out3.reshape(lead + (c_total,) + trail)


def _reference(xs, dim, scale, zero_point, qmin, qmax):
    """torch.cat + fake_quantize_per_tensor_affine (inv_scale formulation)."""
    y = jnp.concatenate(xs, axis=dim).astype(jnp.float32)
    inv_scale = np.float32(1.0) / np.float32(scale)
    q = jnp.clip(jnp.round(y * inv_scale + zero_point), qmin, qmax)
    return (q - zero_point) * np.float32(scale)


if __name__ == "__main__":
    key = jax.random.PRNGKey(0)
    k0, k1, k2, k3 = jax.random.split(key, 4)

    scale, zero_point = 0.05, 128  # deterministic synthetic qparams

    # NCHW inputs, small shapes.
    x0 = jax.random.normal(k0, (2, 4, 16, 16), dtype=jnp.float32) * 2.0
    x1 = jax.random.normal(k1, (2, 4, 16, 16), dtype=jnp.float32) * 2.0

    # dim=0 (batch concat) — force a multi-tile lane grid (post=1024, TL=512).
    y0 = qconcat([x0, x1], dim=0, scale=scale, zero_point=zero_point,
                 lane_tile=512)
    y0 = jax.block_until_ready(y0)
    ref0 = _reference([x0, x1], 0, scale, zero_point, QUANT_MIN, QUANT_MAX)
    np.testing.assert_allclose(np.asarray(y0), np.asarray(ref0),
                               rtol=1e-6, atol=1e-6)
    assert y0.shape == (4, 4, 16, 16)

    # dim=1 (channel concat) — no transposes; default lane tile (full post).
    y1 = qconcat([x0, x1], dim=1, scale=scale, zero_point=zero_point)
    y1 = jax.block_until_ready(y1)
    ref1 = _reference([x0, x1], 1, scale, zero_point, QUANT_MIN, QUANT_MAX)
    np.testing.assert_allclose(np.asarray(y1), np.asarray(ref1),
                               rtol=1e-6, atol=1e-6)
    assert y1.shape == (2, 8, 16, 16)

    # Ragged concat sizes + a partial (masked) last lane tile (post=768, TL=512).
    x2 = jax.random.normal(k2, (2, 4, 16, 12), dtype=jnp.float32) * 2.0
    x3 = jax.random.normal(k3, (3, 4, 16, 12), dtype=jnp.float32) * 2.0
    y2 = qconcat([x2, x3], dim=0, scale=scale, zero_point=zero_point,
                 lane_tile=512)
    y2 = jax.block_until_ready(y2)
    ref2 = _reference([x2, x3], 0, scale, zero_point, QUANT_MIN, QUANT_MAX)
    np.testing.assert_allclose(np.asarray(y2), np.asarray(ref2),
                               rtol=1e-6, atol=1e-6)
    assert y2.shape == (5, 4, 16, 12)

    print("KERNEL_OK")
</pallas_src>

<mosaic_0001>
module attributes {stable_mosaic.version = 11 : i64} {
  func.func @kernel(%arg0: i32, %arg1: i32, %arg2: memref<3xf32, #tpu.memory_space<smem>>, %arg3: memref<1x2x512xf32, #tpu.memory_space<vmem>>, %arg4: memref<1x2x512xf32, #tpu.memory_space<vmem>>, %arg5: memref<1x4x512xf32, #tpu.memory_space<vmem>>) attributes {dimension_semantics = [#tpu.dimension_semantics<parallel>, #tpu.dimension_semantics<parallel>], iteration_bounds = array<i64: 1, 2>, scalar_prefetch = 0 : i64, scratch_operands = 0 : i64, tpu.core_type = #tpu.core_type<tc>, window_params = [{transform_indices = @transform_0, window_bounds = array<i64: 3>}, {transform_indices = @transform_1, window_bounds = array<i64: 1, 2, 512>}, {transform_indices = @transform_2, window_bounds = array<i64: 1, 2, 512>}, {transform_indices = @transform_3, window_bounds = array<i64: 1, 4, 512>}]} {
    %c0 = arith.constant 0 : index
    %0 = memref.load %arg2[%c0] : memref<3xf32, #tpu.memory_space<smem>>
    %c1 = arith.constant 1 : index
    %1 = memref.load %arg2[%c1] : memref<3xf32, #tpu.memory_space<smem>>
    %c2 = arith.constant 2 : index
    %2 = memref.load %arg2[%c2] : memref<3xf32, #tpu.memory_space<smem>>
    %c0_0 = arith.constant 0 : index
    %c0_1 = arith.constant 0 : index
    %c0_2 = arith.constant 0 : index
    %3 = vector.load %arg3[%c0_0, %c0_1, %c0_2] : memref<1x2x512xf32, #tpu.memory_space<vmem>>, vector<1x2x512xf32>
    %4 = vector.broadcast %1 : f32 to vector<1x2x512xf32>
    %5 = arith.mulf %3, %4 : vector<1x2x512xf32>
    %6 = vector.broadcast %2 : f32 to vector<1x2x512xf32>
    %7 = arith.addf %5, %6 : vector<1x2x512xf32>
    %8 = math.roundeven %7 : vector<1x2x512xf32>
    %cst = arith.constant 0.000000e+00 : f32
    %cst_3 = arith.constant 2.550000e+02 : f32
    %9 = vector.broadcast %cst : f32 to vector<1x2x512xf32>
    %10 = arith.maximumf %9, %8 : vector<1x2x512xf32>
    %11 = vector.broadcast %cst_3 : f32 to vector<1x2x512xf32>
    %12 = arith.minimumf %11, %10 : vector<1x2x512xf32>
    %13 = vector.broadcast %2 : f32 to vector<1x2x512xf32>
    %14 = arith.subf %12, %13 : vector<1x2x512xf32>
    %15 = vector.broadcast %0 : f32 to vector<1x2x512xf32>
    %16 = arith.mulf %14, %15 : vector<1x2x512xf32>
    %c0_4 = arith.constant 0 : index
    %c0_5 = arith.constant 0 : index
    %c0_6 = arith.constant 0 : index
    %17 = vector.load %arg5[%c0_4, %c0_5, %c0_6] : memref<1x4x512xf32, #tpu.memory_space<vmem>>, vector<1x2x512xf32>
    tpu.vector_store %arg5[%c0_4, %c0_5, %c0_6], %16 {strides = array<i32>} : memref<1x4x512xf32, #tpu.memory_space<vmem>>, vector<1x2x512xf32>,
    %c0_7 = arith.constant 0 : index
    %c0_8 = arith.constant 0 : index
    %c0_9 = arith.constant 0 : index
    %18 = vector.load %arg4[%c0_7, %c0_8, %c0_9] : memref<1x2x512xf32, #tpu.memory_space<vmem>>, vector<1x2x512xf32>
    %19 = vector.broadcast %1 : f32 to vector<1x2x512xf32>
    %20 = arith.mulf %18, %19 : vector<1x2x512xf32>
    %21 = vector.broadcast %2 : f32 to vector<1x2x512xf32>
    %22 = arith.addf %20, %21 : vector<1x2x512xf32>
    %23 = math.roundeven %22 : vector<1x2x512xf32>
    %cst_10 = arith.constant 0.000000e+00 : f32
    %cst_11 = arith.constant 2.550000e+02 : f32
    %24 = vector.broadcast %cst_10 : f32 to vector<1x2x512xf32>
    %25 = arith.maximumf %24, %23 : vector<1x2x512xf32>
    %26 = vector.broadcast %cst_11 : f32 to vector<1x2x512xf32>
    %27 = arith.minimumf %26, %25 : vector<1x2x512xf32>
    %28 = vector.broadcast %2 : f32 to vector<1x2x512xf32>
    %29 = arith.subf %27, %28 : vector<1x2x512xf32>
    %30 = vector.broadcast %0 : f32 to vector<1x2x512xf32>
    %31 = arith.mulf %29, %30 : vector<1x2x512xf32>
    %c0_12 = arith.constant 0 : index
    %c2_13 = arith.constant 2 : index
    %c0_14 = arith.constant 0 : index
    %32 = vector.load %arg5[%c0_12, %c2_13, %c0_14] : memref<1x4x512xf32, #tpu.memory_space<vmem>>, vector<1x2x512xf32>
    tpu.vector_store %arg5[%c0_12, %c2_13, %c0_14], %31 {strides = array<i32>} : memref<1x4x512xf32, #tpu.memory_space<vmem>>, vector<1x2x512xf32>,
    return
  }
  func.func @transform_0(%arg0: i32, %arg1: i32) -> i32 {
    %c0_i32 = arith.constant 0 : i32
    %c0_i32_0 = arith.constant 0 : i32
    return %c0_i32 : i32
  }
  func.func @transform_1(%arg0: i32, %arg1: i32) -> (i32, i32, i32) {
    %c0_i32 = arith.constant 0 : i32
    %c0_i32_0 = arith.constant 0 : i32
    return %arg0, %c0_i32, %arg1 : i32, i32, i32
  }
  func.func @transform_2(%arg0: i32, %arg1: i32) -> (i32, i32, i32) {
    %c0_i32 = arith.constant 0 : i32
    %c0_i32_0 = arith.constant 0 : i32
    return %arg0, %c0_i32, %arg1 : i32, i32, i32
  }
  func.func @transform_3(%arg0: i32, %arg1: i32) -> (i32, i32, i32) {
    %c0_i32 = arith.constant 0 : i32
    %c0_i32_0 = arith.constant 0 : i32
    return %arg0, %c0_i32, %arg1 : i32, i32, i32
  }
}

</mosaic_0001>

<bundles_post_ra>
// kernel: tpu_custom_call.1
= control target key start
LH: loop header
LB: loop body
LE: loop exit
PB: predicated region body
PF: predicated region fallthrough
CT: control target
= control target key end

     0   :  { %s960_s0 = inlined_call_operand.hbm [shape: f32[3], index: 0, kind: input, shape index: {}]   ;;  %s961_s1 = inlined_call_operand.hbm [shape: f32[1,2,1024], index: 1, kind: input, shape index: {}]   ;;  %s962_s2 = inlined_call_operand.hbm [shape: f32[1,2,1024], index: 2, kind: input, shape index: {}]   ;;  %s963_s3 = inlined_call_operand.hbm [shape: f32[1,4,1024], index: 3, kind: output, shape index: {}]  }
   0x1   :  { %964 = sst [smem:[#allocation14_spill]] %s960_s0 }
   0x2   :  { %8 = vsyncpa [#allocation5], 0 }
   0x3   :  { %9 = vsyncpa [#allocation3], 0 }
   0x4   :  { %11 = vsyncpa [#allocation3 + $0x1], 0 }
   0x5   :  { %12 = vsyncpa [#allocation8], 0 }
   0x6   :  { %14 = vsyncpa [#allocation8 + $0x1], 0 }
   0x7   :  { %15 = vsyncpa [#allocation4], 0 }
   0x8   :  { %17 = vsyncpa [#allocation4 + $0x1], 0  ;;  %s768_s12 = smov 0   ;;  %s770_s13 = smov 0  }
   0x9   :  { %s772_s14 = smov 0   ;;  %s774_s15 = smov 0  }
   0xa   :  { %s776_s16 = smov 0   ;;  %s778_s17 = smov 0  }
   0xb LB: > { %s463_s18 = sadd.s32 4294967295, %s742_s17   ;;  %s464_s19 = sadd.s32 4294967294, %s742_s17   ;;  %s742_s17 = sphi %s778_s17, %s23_s17   ;;  %s738_s16 = sphi %s776_s16, %s979_s16   ;;  %s734_s15 = sphi %s774_s15, %s978_s15   ;;  %s730_s14 = sphi %s772_s14, %s977_s14   ;;  %s726_s13 = sphi %s770_s13, %s976_s13   ;;  %s722_s12 = sphi %s768_s12, %s975_s12  }
   0xc   : > { %p72_p0 = scmp.ne.s32.totalorder %s730_s14, %s726_s13  ;;  %p78_p1 = scmp.ne.s32.totalorder %s726_s13, %s722_s12 }
   0xd   : > { %p804_p2 = scmp.eq.s32.totalorder %s463_s18, 0  ;;  %p132_p3 = scmp.eq.s32.totalorder %s463_s18, 1 }
   0xe   : > { %p138_p4 = scmp.eq.s32.totalorder %s464_s19, 1  ;;  %p465_p5 = scmp.ge.s32.totalorder %s742_s17, 1 }
   0xf   : > { %p811_p6 = por %p804_p2, %p78_p1  ;;  %p818_p7 = por %p132_p3, %p72_p0 }
  0x10   : > { %p822_p8 = por %p138_p4, %p78_p1  ;;  %p145_p9 = scmp.lt.s32.totalorder %s742_s17, 3 }
  0x11   : > { %s65_s25 = sadd.s32 1, %s730_s14  ;;  %s32_s26 = sadd.s32 1, %s738_s16 }
  0x12   : > { %s968_s23 = scalar_select %p822_p8, 1, 0 }
  0x13   : > { %p827_p10 = pnand %p465_p5, %p145_p9  ;;  %p73_p13 = scmp.eq.s32.totalorder %s742_s17, 0 }
  0x14   : > { %p33_p3 = scmp.ge.s32.totalorder %s32_s26, 2  ;;  %p535_p5 = scmp.lt.s32.totalorder %s742_s17, 2 }
  0x15   : > { %p519_p12 = pneg %p827_p10  ;;  %p842_p4 = por %p73_p13, %p72_p0 }
  0x16   : > { %s848_s28 = sand.u32 1, %s730_s14   ;;  %s744_s29 = smov [#allocation2]  }
  0x17   : > { %p520_p1 = pnand %p519_p12, %p804_p2  ;;  %s971_s0 = sld [smem:[#allocation14_spill]] }
  0x18   : > { %s981_s26 = smov (%p33_p3, %s32_s26), 0  ;;  %s468_s5 = sshll.u32 %s848_s28, 3 }
  0x19   : > { %s61_s6 = ssub.s32 %s738_s16, %s981_s26  ;;  %s490_s7 = sshll.u32 %s738_s16, 7 }
  0x1a   : > { %p63_p0 = scmp.eq.s32.totalorder %s61_s6, 0  ;;  %s179_s10 = scalar_lea.hbm %s961_s1, %s490_s7 }
  0x1b   : > { %s171_s11 = scalar_lea.vmem [#allocation6], %s468_s5  ;;  %p869_p9 = pnand %p535_p5, %p842_p4 }
  0x1c   : > { %s181_s18 = sshll.u32 %s171_s11, 4  ;;  %s876_s6 = scalar_lea.hbm %s962_s2, %s490_s7  ;;  %s182_s18 = int_to_ptr.vmem [resolvable:$true] %s181_s18 }
  0x1d   : > { %522 = dma.hbm_to_smem (!%p520_p1), %s971_s0, 16, %s744_s29, [#allocation5]  }
  0x1e   : > { %s863_s19 = scalar_select %p63_p0, %s730_s14, %s65_s25  }
  0x1f   : > { %s168_s8 = scalar_lea.sflag [#allocation3], %s848_s28  ;;  %p600_p12 = pneg %p869_p9 }
  0x20   : > { %s611_s9 = scalar_lea.vmem %s182_s18, 128  ;;  %s745_s25 = smov [#allocation6]  }
  0x21   : > { %p612_p13 = scmp.ne.s32.totalorder %s182_s18, %s611_s9  ;;  %s616_s27 = sshll.u32 %s745_s25, 4  ;;  %s617_s27 = int_to_ptr.vmem [resolvable:$false] %s616_s27 }
  0x22   : > { %s618_s11 = scalar_lea.vmem %s617_s27, 256  ;;  %p619_p4 = scmp.lt.s32.totalorder %s182_s18, %s617_s27 }
  0x23   : > { %p614_p1 = pnand %p612_p13, %p600_p12  ;;  %p620_p5 = scmp.lt.s32.totalorder %s618_s11, %s611_s9 }
  0x25   : > { %p615_p3 = pneg %p614_p1  ;;  %p621_p0 = por %p620_p5, %p619_p4 }
  0x27   : > { %p622_p11 = pnand %p621_p0, %p615_p3 }
  0x29   : > { %625 = shalt.err (!%p622_p11)
}
  0x2a   : > { %526 = dma.hbm_to_vmem [thread:$0]  (!%p869_p9), %s179_s10, 128, %s182_s18, %s168_s8  }
  0x2b   : > { %s192_s7 = scalar_lea.vmem [#allocation7], %s468_s5  ;;  %s189_s4 = scalar_lea.sflag [#allocation8], %s848_s28 }
  0x2c   : > { %s202_s30 = sshll.u32 %s192_s7, 4  ;;  %s746_s25 = smov [#allocation7]   ;;  %s203_s30 = int_to_ptr.vmem [resolvable:$true] %s202_s30 }
  0x2d   : > { %s639_s0 = scalar_lea.vmem %s203_s30, 128  ;;  %s644_s9 = sshll.u32 %s746_s25, 4  ;;  %s645_s9 = int_to_ptr.vmem [resolvable:$false] %s644_s9 }
  0x2e   : > { %p640_p13 = scmp.ne.s32.totalorder %s203_s30, %s639_s0  ;;  %s646_s27 = scalar_lea.vmem %s645_s9, 256 }
  0x2f   : > { %p647_p11 = scmp.lt.s32.totalorder %s203_s30, %s645_s9  ;;  %p648_p3 = scmp.lt.s32.totalorder %s646_s27, %s639_s0 }
  0x30   : > { %p642_p1 = pnand %p640_p13, %p600_p12 }
  0x31   : > { %p649_p4 = por %p648_p3, %p647_p11 }
  0x32   : > { %p643_p8 = pneg %p642_p1 }
  0x34   : > { %p650_p5 = pnand %p649_p4, %p643_p8 }
  0x36   : > { %653 = shalt.err (!%p650_p5)
}
  0x37   : > { %529 = dma.hbm_to_vmem [thread:$0]  (!%p869_p9), %s876_s6, 128, %s203_s30, %s189_s4  }
  0x38   : > { %211 = sbr.rel (%p827_p10) target bundleno = 114 (0x72), region = 32 }
  0x3d   : > { %705 = dma.done.wait (%p804_p2), [#allocation5], 16  }
  0x3e   : > { %707 = vsyncadd (%p804_p2), [#allocation5], 4294967280  ;;  %s900_s28 = sand.u32 1, %s726_s13  }
  0x3f   : > { %s476_s0 = sshll.u32 %s900_s28, 3  ;;  %s218_s5 = scalar_lea.sflag [#allocation3], %s900_s28 }
  0x40   : > { %s221_s10 = scalar_lea.vmem [#allocation6], %s476_s0 }
  0x41   : > { %709 = dma.done.wait (%p811_p6), %s218_s5, 128  }
  0x42   : > { %711 = vsyncadd (%p811_p6), %s218_s5, 4294967168  ;;  %s227_s24 = scalar_lea.sflag [#allocation8], %s900_s28  ;;  %s230_s18 = scalar_lea.vmem [#allocation7], %s476_s0 }
  0x43   : > { %713 = dma.done.wait (%p811_p6), %s227_s24, 128  }
  0x44   : > { %715 = vsyncadd (%p811_p6), %s227_s24, 4294967168 }
  0x45   : > { %235 = sfence }
  0x46   : > { %s479_s20 = sld [smem:[#allocation2 + $0x1]]  ;;  %v265_v0 = vld [vmem:[%s221_s10] sm:$0xff]  ;;  %v296_v1 = vld [vmem:[%s230_s18] sm:$0xff]  ;;  %s478_s6 = sshll.u32 %s900_s28, 4 }
  0x47   : > { %s480_s29 = sld [smem:[#allocation2 + $0x2]]  ;;  %s492_s8 = sshll.u32 %s734_s15, 8 }
  0x48   : > { %s262_s21 = sld [smem:[#allocation2]]  ;;  %s258_s11 = scalar_lea.vmem [#allocation9], %s478_s6 }
  0x49   : > { %s341_s7 = sshll.u32 %s258_s11, 4  ;;  %s918_s25 = scalar_lea.hbm %s963_s3, %s492_s8  ;;  %s342_s7 = int_to_ptr.vmem [resolvable:$true] %s341_s7 }
  0x4a   : > { %s325_s9 = scalar_lea.sflag [#allocation4], %s900_s28  ;;  %s654_s27 = scalar_lea.vmem %s342_s7, 256 }
  0x4b   : > { %p655_p2 = scmp.ne.s32.totalorder %s342_s7, %s654_s27  ;;  %s747_s15 = smov [#allocation9]  }
  0x4c   : > { %v266_v2 = vstv %s479_s20  ;;  %s658_s0 = sshll.u32 %s747_s15, 4  ;;  %s659_s0 = int_to_ptr.vmem [resolvable:$false] %s658_s0 }
  0x4d   : > { %v267_v3 = vmul.f32 %v266_v2, %v265_v0  ;;  %v268_v4 = vstv %s480_s29  ;;  %v297_v5 = vmul.f32 %v296_v1, %v266_v2  ;;  %p656_p6 = pnand %p655_p2, %p818_p7  ;;  %s660_s5 = scalar_lea.vmem %s659_s0, 512 }
  0x4e   : > { %v274_v25 = vstv %s262_s21  ;;  %p661_p10 = scmp.lt.s32.totalorder %s342_s7, %s659_s0  ;;  %p662_p9 = scmp.lt.s32.totalorder %s660_s5, %s654_s27 }
  0x4f   : > { %v269_v6 = vadd.f32 %v268_v4, %v267_v3  ;;  %v298_v7 = vadd.f32 %v297_v5, %v268_v4  ;;  %p657_p8 = pneg %p656_p6 }
  0x50   : > { %p663_p12 = por %p662_p9, %p661_p10 }
  0x51   : > { %v495_v8 = vcvt.f32.s32 %v269_v6  ;;  %v493_v9 = vand.u32 2147483647, %v269_v6  ;;  %v503_v10 = vcvt.f32.s32 %v298_v7  ;;  %v498_v12 = vand.u32 2147483648, %v269_v6 }
  0x52   : > { %v501_v13 = vand.u32 2147483647, %v298_v7  ;;  %v506_v15 = vand.u32 2147483648, %v298_v7  ;;  %p664_p0 = pnand %p663_p12, %p657_p8 }
  0x53   : > { %v496_v11 = vcvt.s32.f32 %v495_v8  ;;  %v504_v14 = vcvt.s32.f32 %v503_v10  ;;  %vm494_vm0 = vcmp.lt.f32.partialorder %v493_v9, 8388608.0 }
  0x54   : > { %vm502_vm1 = vcmp.lt.f32.partialorder %v501_v13, 8388608.0 }
  0x55   : > { %v497_v16 = vand.u32 2147483647, %v496_v11  ;;  %v505_v17 = vand.u32 2147483647, %v504_v14 }
  0x57   : > { %v499_v18 = vor.u32 %v498_v12, %v497_v16  ;;  %v507_v19 = vor.u32 %v506_v15, %v505_v17 }
  0x59   : > { %v500_v20 = vsel %vm494_vm0, %v499_v18, %v269_v6  ;;  %v508_v22 = vsel %vm502_vm1, %v507_v19, %v298_v7 }
  0x5a   : > { %v271_v21 = vmax.f32 %v500_v20, 0.0  ;;  %v300_v23 = vmax.f32 %v508_v22, 0.0 }
  0x5c   : > { %v272_v24 = vmin.f32 %v271_v21, 255.0  ;;  %v301_v26 = vmin.f32 %v300_v23, 255.0 }
  0x5e   : > { %v273_v27 = vsub.f32 %v272_v24, %v268_v4  ;;  %v302_v28 = vsub.f32 %v301_v26, %v268_v4 }
  0x60   : > { %v275_v29 = vmul.f32 %v274_v25, %v273_v27  ;;  %v303_v30 = vmul.f32 %v302_v28, %v274_v25 }
  0x62   : > { %481 = vst.sshfl [vmem:[%s258_s11] sm:$0xf pattern:$0x76325410] %v275_v29  ;;  %v277_v31 = vcombine.high %v275_v29, %v275_v29  ;;  %v305_v32 = vcombine.low %v303_v30, %v303_v30 }
  0x63   : > { %484 = vst.sshfl [vmem:[%s258_s11 + $0x8] sm:$0xf0 pattern:$0x76325410] %v303_v30 }
  0x64   : > { %482 = vst.sshfl [vmem:[%s258_s11 + $0x8] sm:$0xf pattern:$0x76325410] %v277_v31 }
  0x65   : > { %483 = vst.sshfl [vmem:[%s258_s11] sm:$0xf0 pattern:$0x76325410] %v305_v32 }
  0x66   : > { %667 = shalt.err (!%p664_p0)
}
  0x67   : > { %s668_s10 = scalar_lea.hbm %s918_s25, 256  ;;  %s672_s18 = scalar_lea.hbm %s963_s3, 512 }
  0x68   : > { %p669_p13 = scmp.ne.s32.totalorder %s918_s25, %s668_s10  ;;  %p673_p3 = scmp.lt.s32.totalorder %s918_s25, %s963_s3 }
  0x69   : > { %p674_p4 = scmp.lt.s32.totalorder %s672_s18, %s668_s10 }
  0x6a   : > { %p670_p1 = pnand %p669_p13, %p818_p7 }
  0x6b   : > { %p675_p5 = por %p674_p4, %p673_p3 }
  0x6c   : > { %p671_p11 = pneg %p670_p1 }
  0x6e   : > { %p676_p2 = pnand %p675_p5, %p671_p11 }
  0x70   : > { %679 = shalt.err (!%p676_p2)
}
  0x71   : > { %517 = dma.vmem_to_hbm [thread:$0]  (%p818_p7), %s342_s7, 256, %s918_s25, %s325_s9  }
  0x72 PF: > { %s353_s21 = sand.u32 1, %s722_s12   ;;  %p973_p6 = scmp.ne.s32.totalorder %s968_s23, 0 }
  0x73   : > { %p974_p8 = scmp.ge.s32.totalorder %s742_s17, 2  ;;  %s354_s6 = scalar_lea.sflag [#allocation4], %s353_s21 }
  0x75   : > { %p531_p10 = pnand %p974_p8, %p973_p6 }
  0x77   : > { %p532_p9 = pneg %p531_p10 }
  0x79   : > { %717 = dma.done.wait (%p532_p9), %s354_s6, 256  }
  0x7a   : > { %719 = vsyncadd (%p532_p9), %s354_s6, 4294967040  ;;  %s23_s17 = sadd.s32 1, %s742_s17   ;;  %s975_s12 = smov %s726_s13 }
  0x7b   : > { %p20_p12 = scmp.ge.s32.totalorder %s23_s17, 4   ;;  %s976_s13 = smov %s730_s14 }
  0x7c   : > { %s977_s14 = smov %s863_s19  ;;  %s978_s15 = smov %s738_s16 }
  0x7d   : > { %s979_s16 = smov %s981_s26  ;;  %22 = sbr.rel (!%p20_p12) target bundleno = 11 (0xb), region = 95 }
  0x82   :  { %359 = vsyncpa [#allocation3], 1 }
  0x83   :  { %361 = vsyncpa [#allocation3 + $0x1], 1 }
  0x84   :  { %362 = vsyncpa [#allocation8], 1 }
  0x85   :  { %364 = vsyncpa [#allocation8 + $0x1], 1 }
  0x86   :  { %365 = vsyncpa [#allocation4], 1 }
  0x87   :  { %367 = vsyncpa [#allocation4 + $0x1], 1 }
  0x88   :  { %368 = vsyncpa [#allocation5], 1 }
  0x89   :  { %370 = vsyncpa [#allocation5 + $0x1], 1 }

</bundles_post_ra>
